<compile_context>
chip_gen: v7x
topology: tpu7x:2x2x1
jax: 0.10.0
libtpu: 0.0.40
codegen_flags: <defaults>
</compile_context>

<pallas_src>
import functools

import jax
import jax.numpy as jnp
import numpy as np
from jax import lax
from jax.experimental import pallas as pl
from jax.experimental.pallas import tpu as pltpu


# --------------------------------------------------------------------------- #
# helpers
# --------------------------------------------------------------------------- #
def _pick_tile(n, target):
    """Largest t <= target with t % 8 == 0 and n % t == 0; fallback: t = n."""
    if n % 8 != 0:
        return n
    t = min(target - (target % 8), n)
    while t >= 8:
        if n % t == 0:
            return t
        t -= 8
    return n


def _vmem_limit(estimate_bytes):
    """Explicit scoped-VMEM limit: estimate + headroom, clamped for v7x."""
    return int(min(max(estimate_bytes + (8 << 20), 32 << 20), 56 << 20))


# --------------------------------------------------------------------------- #
# phase 1: normalized positive / anchor embeddings (row-tiled, parallel)
# --------------------------------------------------------------------------- #
def _normalize_kernel(x_ref, pn_ref, an_ref, *, num_utt):
    # x_ref: (M, tn, D) -- the utterance axis is leading (offset-only), so the
    # anchor accumulation is pure full-vreg VPU adds (no sublane gathers).
    pos = x_ref[0]
    anc = x_ref[1]
    for m in range(2, num_utt):          # small, static utterance count
        anc = anc + x_ref[m]
    anc = anc * jnp.float32(1.0 / (num_utt - 1))     # true mean (matches torch)

    eps2 = jnp.float32(1e-16)            # (1e-8)^2  ==  max(norm, 1e-8)
    pos_n = pos * lax.rsqrt(
        jnp.maximum(jnp.sum(pos * pos, axis=-1, keepdims=True), eps2))
    anc_n = anc * lax.rsqrt(
        jnp.maximum(jnp.sum(anc * anc, axis=-1, keepdims=True), eps2))

    pn_ref[...] = pos_n.astype(pn_ref.dtype)   # bf16 cast (if enabled) happens
    an_ref[...] = anc_n.astype(an_ref.dtype)   # here, inside the pipeline


# --------------------------------------------------------------------------- #
# phase 2: row-tiled cosine matmul + per-row statistics (parallel)
# --------------------------------------------------------------------------- #
def _cos_stats_kernel(pn_ref, an_ref, lab_col_ref, lab_row_ref, stats_ref,
                      *, tm, n):
    i = pl.program_id(0)

    # (tm, D) x (N, D)^T -> (tm, N) cosine block; f32 accumulate on the MXU.
    cos = lax.dot_general(
        pn_ref[...], an_ref[...],
        dimension_numbers=(((1,), (1,)), ((), ())),
        preferred_element_type=jnp.float32)

    # Positive mask from exact int32 label equality; everything else (negative
    # sums/counts, the `1 - cos` shift) is derived from totals in the wrapper,
    # so no second (tm, N) mask or `1 - cos` array is ever materialized.
    pos_mask = (lab_col_ref[...] == lab_row_ref[...]).astype(jnp.float32)

    row_pos = jnp.sum(cos * pos_mask, axis=1, keepdims=True)   # (tm, 1)
    row_tot = jnp.sum(cos, axis=1, keepdims=True)              # (tm, 1)
    row_cnt = jnp.sum(pos_mask, axis=1, keepdims=True)         # (tm, 1)

    # top-1: argmax(cos) with first-occurrence tie-break == argmin(1 - cos).
    row_max = jnp.max(cos, axis=1, keepdims=True)              # (tm, 1)
    col_idx = lax.broadcasted_iota(jnp.int32, (tm, n), 1)
    masked_col = jnp.where(cos == row_max, col_idx, jnp.int32(n))
    pred = jnp.min(masked_col, axis=1, keepdims=True)          # (tm, 1)
    row_idx = lax.broadcasted_iota(jnp.int32, (tm, 1), 0) + i * tm
    row_cor = (pred == row_idx).astype(jnp.float32)            # (tm, 1)

    # Lane-dense (tm, 128) partial-stats slab: lanes 0..3 carry the per-row
    # statistics, the rest are zero. Unmasked 128-wide stores.
    lane = lax.broadcasted_iota(jnp.int32, (tm, 128), 1)
    stats = (jnp.where(lane == 0, row_pos, 0.0)
             + jnp.where(lane == 1, row_tot, 0.0)
             + jnp.where(lane == 2, row_cnt, 0.0)
             + jnp.where(lane == 3, row_cor, 0.0))
    stats_ref[...] = stats


# --------------------------------------------------------------------------- #
# wrapper
# --------------------------------------------------------------------------- #
def angle_proto2(x, label, *, norm_row_tile=512, mm_row_tile=256,
                 use_bf16_matmul=False):
    """x: (N, M, D) float, label: (N,) int speaker ids. Returns (nloss, prec1)."""
    N, M, D = x.shape
    assert M >= 2

    x = x.astype(jnp.float32)
    # (N, M, D) -> (M, N, D): utterance axis leading. D stays unpadded (full
    # last block dim everywhere), so there is no extra padding pass over x.
    # TODO(synk): the transpose still costs one extra HBM pass over x; it could
    # be folded into the operand DMA via allow_input_fusion once verified.
    x_t = jnp.transpose(x, (1, 0, 2))

    emb_dtype = jnp.bfloat16 if use_bf16_matmul else jnp.float32
    dsz = 2 if use_bf16_matmul else 4

    lab = label.astype(jnp.int32)
    lab_col = lab.reshape(N, 1)
    lab_row = lab.reshape(1, N)

    tn = _pick_tile(N, norm_row_tile)    # phase-1 (mem-bound) row tile
    tm = _pick_tile(N, mm_row_tile)      # phase-2 (MXU) row tile

    # ------------------ phase 1: normalize positives / anchors -------------
    p1_est = 2 * (M * tn * D * 4) + 4 * (tn * D * dsz)
    pn, an = pl.pallas_call(
        functools.partial(_normalize_kernel, num_utt=M),
        grid=(N // tn,),
        in_specs=[pl.BlockSpec((M, tn, D), lambda i: (0, i, 0))],
        out_specs=(pl.BlockSpec((tn, D), lambda i: (i, 0)),
                   pl.BlockSpec((tn, D), lambda i: (i, 0))),
        out_shape=(jax.ShapeDtypeStruct((N, D), emb_dtype),
                   jax.ShapeDtypeStruct((N, D), emb_dtype)),
        compiler_params=pltpu.CompilerParams(
            dimension_semantics=("parallel",),
            vmem_limit_bytes=_vmem_limit(p1_est)),
    )(x_t)

    # ------------------ phase 2: cosine matmul + per-row stats -------------
    # an stays resident (constant index map); pn is streamed per row tile.
    # TODO(synk): for very large N (an or the (tm, N) block no longer fits),
    # add a second (column) grid axis with running-max/argmax carry.
    p2_est = (2 * tm * D * dsz + 2 * N * D * dsz + 6 * tm * N * 4
              + 2 * tm * 128 * 4 + 4 * N * 4)
    stats = pl.pallas_call(
        functools.partial(_cos_stats_kernel, tm=tm, n=N),
        grid=(N // tm,),
        in_specs=[
            pl.BlockSpec((tm, D), lambda i: (i, 0)),   # pn row tile
            pl.BlockSpec((N, D), lambda i: (0, 0)),    # an (resident)
            pl.BlockSpec((tm, 1), lambda i: (i, 0)),   # labels of tile rows
            pl.BlockSpec((1, N), lambda i: (0, 0)),    # labels of all columns
        ],
        out_specs=pl.BlockSpec((tm, 128), lambda i: (i, 0)),
        out_shape=jax.ShapeDtypeStruct((N, 128), jnp.float32),
        compiler_params=pltpu.CompilerParams(
            dimension_semantics=("parallel",),
            vmem_limit_bytes=_vmem_limit(p2_est)),
    )(pn, an, lab_col, lab_row)

    # Trivial JAX combine of the per-row partials (N x 4 numbers).
    pos_cos = jnp.sum(stats[:, 0])
    tot_cos = jnp.sum(stats[:, 1])
    pos_cnt = jnp.sum(stats[:, 2])
    correct = jnp.sum(stats[:, 3])

    n_f = jnp.float32(N)
    pos_sum = pos_cnt - pos_cos          # sum of (1 - cos) over positive pairs
    tot_sum = n_f * n_f - tot_cos        # sum of (1 - cos) over all pairs
    neg_sum = tot_sum - pos_sum
    neg_cnt = n_f * n_f - pos_cnt
    nloss = pos_sum / pos_cnt - neg_sum / neg_cnt + 2.0
    prec1 = 100.0 * correct / n_f
    return nloss, prec1


# --------------------------------------------------------------------------- #
# pure-JAX reference mirroring the PyTorch forward semantics
# --------------------------------------------------------------------------- #
def _reference(x, label):
    x = x.astype(jnp.float32)
    out_anchor = jnp.mean(x[:, 1:, :], axis=1)
    out_positive = x[:, 0, :]
    eps = 1e-8
    pn = out_positive / jnp.maximum(
        jnp.linalg.norm(out_positive, axis=-1, keepdims=True), eps)
    an = out_anchor / jnp.maximum(
        jnp.linalg.norm(out_anchor, axis=-1, keepdims=True), eps)
    cos_sim = 1.0 - pn @ an.T
    lab = label.astype(jnp.int32)
    pos_mask = (lab[None, :] == lab[:, None]).astype(jnp.float32)
    neg_mask = 1.0 - pos_mask
    nloss = (jnp.sum(cos_sim * pos_mask) / jnp.sum(pos_mask)
             - jnp.sum(cos_sim * neg_mask) / jnp.sum(neg_mask) + 2.0)
    pred = jnp.argmax(-cos_sim, axis=1)
    prec1 = 100.0 * jnp.mean(
        (pred == jnp.arange(cos_sim.shape[0])).astype(jnp.float32))
    return nloss, prec1


if __name__ == "__main__":
    key = jax.random.PRNGKey(0)
    kx, kl = jax.random.split(key)
    N, M, D = 8, 3, 64                  # speakers, utterances/speaker, emb dim
    x = jax.random.normal(kx, (N, M, D), dtype=jnp.float32)
    label = jax.random.randint(kl, (N,), 0, 4, dtype=jnp.int32)

    # f32 path (exact vs. reference)
    fn = jax.jit(angle_proto2)
    nloss, prec1 = fn(x, label)
    jax.block_until_ready((nloss, prec1))

    ref_loss, ref_prec = _reference(x, label)
    assert np.allclose(np.asarray(nloss), np.asarray(ref_loss),
                       rtol=1e-5, atol=1e-5), (nloss, ref_loss)
    assert np.allclose(np.asarray(prec1), np.asarray(ref_prec),
                       rtol=1e-5, atol=1e-5), (prec1, ref_prec)

    # bf16-at-the-MXU-boundary path (production default for large N/D);
    # looser tolerance on the loss, as documented.
    fn_bf16 = jax.jit(functools.partial(angle_proto2, use_bf16_matmul=True))
    nloss_bf, prec_bf = fn_bf16(x, label)
    jax.block_until_ready((nloss_bf, prec_bf))
    assert np.allclose(np.asarray(nloss_bf), np.asarray(ref_loss),
                       rtol=3e-2, atol=3e-2), (nloss_bf, ref_loss)

    print("KERNEL_OK")
</pallas_src>

<mosaic_0001>
module attributes {stable_mosaic.version = 11 : i64} {
  func.func @_cos_stats_kernel(%arg0: i32, %arg1: memref<8x64xf32, #tpu.memory_space<vmem>>, %arg2: memref<8x64xf32, #tpu.memory_space<vmem>>, %arg3: memref<8x1xi32, #tpu.memory_space<vmem>>, %arg4: memref<1x8xi32, #tpu.memory_space<vmem>>, %arg5: memref<8x128xf32, #tpu.memory_space<vmem>>) attributes {dimension_semantics = [#tpu.dimension_semantics<parallel>], iteration_bounds = array<i64: 1>, scalar_prefetch = 0 : i64, scratch_operands = 0 : i64, tpu.core_type = #tpu.core_type<tc>, window_params = [{transform_indices = @transform_0, window_bounds = array<i64: 8, 64>}, {pipeline_mode = #tpu.pipeline_mode<synchronous>, transform_indices = @transform_1, window_bounds = array<i64: 8, 64>}, {transform_indices = @transform_2, window_bounds = array<i64: 8, 1>}, {pipeline_mode = #tpu.pipeline_mode<synchronous>, transform_indices = @transform_3, window_bounds = array<i64: 1, 8>}, {transform_indices = @transform_4, window_bounds = array<i64: 8, 128>}]} {
    %c0 = arith.constant 0 : index
    %c0_0 = arith.constant 0 : index
    %0 = vector.load %arg1[%c0, %c0_0] : memref<8x64xf32, #tpu.memory_space<vmem>>, vector<8x64xf32>
    %c0_1 = arith.constant 0 : index
    %c0_2 = arith.constant 0 : index
    %1 = vector.load %arg2[%c0_1, %c0_2] : memref<8x64xf32, #tpu.memory_space<vmem>>, vector<8x64xf32>
    %cst = arith.constant dense<0.000000e+00> : vector<8x8xf32>
    %2 = tpu.matmul %0, %1, %cst {dimension_numbers = #tpu.dot_dimension_numbers<[1], [1], [0], [0], [0, 0, 1, 0], [], []>} : vector<8x64xf32>, vector<8x64xf32>, vector<8x8xf32> -> vector<8x8xf32>
    %c0_3 = arith.constant 0 : index
    %c0_4 = arith.constant 0 : index
    %3 = vector.load %arg3[%c0_3, %c0_4] : memref<8x1xi32, #tpu.memory_space<vmem>>, vector<8x1xi32>
    %c0_5 = arith.constant 0 : index
    %c0_6 = arith.constant 0 : index
    %4 = vector.load %arg4[%c0_5, %c0_6] : memref<1x8xi32, #tpu.memory_space<vmem>>, vector<1x8xi32>
    %5 = vector.broadcast %3 : vector<8x1xi32> to vector<8x8xi32>
    %6 = vector.broadcast %4 : vector<1x8xi32> to vector<8x8xi32>
    %7 = arith.cmpi eq, %5, %6 : vector<8x8xi32>
    %8 = arith.extui %7 : vector<8x8xi1> to vector<8x8xi32>
    %9 = arith.sitofp %8 : vector<8x8xi32> to vector<8x8xf32>
    %10 = arith.mulf %2, %9 : vector<8x8xf32>
    %cst_7 = arith.constant dense<0.000000e+00> : vector<8xf32>
    %11 = vector.multi_reduction <add>, %10, %cst_7 [1] : vector<8x8xf32> to vector<8xf32>
    %12 = vector.shape_cast %11 : vector<8xf32> to vector<8x1xf32>
    %cst_8 = arith.constant dense<0.000000e+00> : vector<8xf32>
    %13 = vector.multi_reduction <add>, %2, %cst_8 [1] : vector<8x8xf32> to vector<8xf32>
    %14 = vector.shape_cast %13 : vector<8xf32> to vector<8x1xf32>
    %cst_9 = arith.constant dense<0.000000e+00> : vector<8xf32>
    %15 = vector.multi_reduction <add>, %9, %cst_9 [1] : vector<8x8xf32> to vector<8xf32>
    %16 = vector.shape_cast %15 : vector<8xf32> to vector<8x1xf32>
    %cst_10 = arith.constant dense<0xFF800000> : vector<8xf32>
    %17 = vector.multi_reduction <maximumf>, %2, %cst_10 [1] : vector<8x8xf32> to vector<8xf32>
    %18 = vector.shape_cast %17 : vector<8xf32> to vector<8x1xf32>
    %19 = tpu.iota {dimensions = array<i32: 1>} : vector<8x8xi32>
    %20 = vector.broadcast %18 : vector<8x1xf32> to vector<8x8xf32>
    %21 = arith.cmpf oeq, %2, %20 : vector<8x8xf32>
    %c8_i32 = arith.constant 8 : i32
    %22 = vector.broadcast %c8_i32 : i32 to vector<8x8xi32>
    %23 = arith.select %21, %19, %22 : vector<8x8xi1>, vector<8x8xi32>
    %cst_11 = arith.constant dense<2147483647> : vector<8xi32>
    %24 = vector.multi_reduction <minsi>, %23, %cst_11 [1] : vector<8x8xi32> to vector<8xi32>
    %25 = vector.shape_cast %24 : vector<8xi32> to vector<8x1xi32>
    %26 = tpu.iota {dimensions = array<i32: 0>} : vector<8x1xi32>
    %c8_i32_12 = arith.constant 8 : i32
    %27 = arith.muli %arg0, %c8_i32_12 : i32
    %28 = vector.broadcast %27 : i32 to vector<8x1xi32>
    %29 = arith.addi %26, %28 : vector<8x1xi32>
    %30 = arith.cmpi eq, %25, %29 : vector<8x1xi32>
    %31 = arith.extui %30 : vector<8x1xi1> to vector<8x1xi32>
    %32 = arith.sitofp %31 : vector<8x1xi32> to vector<8x1xf32>
    %33 = tpu.iota {dimensions = array<i32: 1>} : vector<8x128xi32>
    %c0_i32 = arith.constant 0 : i32
    %34 = vector.broadcast %c0_i32 : i32 to vector<8x128xi32>
    %35 = arith.cmpi eq, %33, %34 : vector<8x128xi32>
    %cst_13 = arith.constant 0.000000e+00 : f32
    %36 = vector.shape_cast %12 : vector<8x1xf32> to vector<8x1xf32>
    %37 = vector.broadcast %36 : vector<8x1xf32> to vector<8x128xf32>
    %38 = vector.broadcast %cst_13 : f32 to vector<8x128xf32>
    %39 = arith.select %35, %37, %38 : vector<8x128xi1>, vector<8x128xf32>
    %c1_i32 = arith.constant 1 : i32
    %40 = vector.broadcast %c1_i32 : i32 to vector<8x128xi32>
    %41 = arith.cmpi eq, %33, %40 : vector<8x128xi32>
    %cst_14 = arith.constant 0.000000e+00 : f32
    %42 = vector.shape_cast %14 : vector<8x1xf32> to vector<8x1xf32>
    %43 = vector.broadcast %42 : vector<8x1xf32> to vector<8x128xf32>
    %44 = vector.broadcast %cst_14 : f32 to vector<8x128xf32>
    %45 = arith.select %41, %43, %44 : vector<8x128xi1>, vector<8x128xf32>
    %46 = arith.addf %39, %45 : vector<8x128xf32>
    %c2_i32 = arith.constant 2 : i32
    %47 = vector.broadcast %c2_i32 : i32 to vector<8x128xi32>
    %48 = arith.cmpi eq, %33, %47 : vector<8x128xi32>
    %cst_15 = arith.constant 0.000000e+00 : f32
    %49 = vector.shape_cast %16 : vector<8x1xf32> to vector<8x1xf32>
    %50 = vector.broadcast %49 : vector<8x1xf32> to vector<8x128xf32>
    %51 = vector.broadcast %cst_15 : f32 to vector<8x128xf32>
    %52 = arith.select %48, %50, %51 : vector<8x128xi1>, vector<8x128xf32>
    %53 = arith.addf %46, %52 : vector<8x128xf32>
    %c3_i32 = arith.constant 3 : i32
    %54 = vector.broadcast %c3_i32 : i32 to vector<8x128xi32>
    %55 = arith.cmpi eq, %33, %54 : vector<8x128xi32>
    %cst_16 = arith.constant 0.000000e+00 : f32
    %56 = vector.shape_cast %32 : vector<8x1xf32> to vector<8x1xf32>
    %57 = vector.broadcast %56 : vector<8x1xf32> to vector<8x128xf32>
    %58 = vector.broadcast %cst_16 : f32 to vector<8x128xf32>
    %59 = arith.select %55, %57, %58 : vector<8x128xi1>, vector<8x128xf32>
    %60 = arith.addf %53, %59 : vector<8x128xf32>
    %c0_17 = arith.constant 0 : index
    %c0_18 = arith.constant 0 : index
    %61 = vector.load %arg5[%c0_17, %c0_18] : memref<8x128xf32, #tpu.memory_space<vmem>>, vector<8x128xf32>
    tpu.vector_store %arg5[%c0_17, %c0_18], %60 {strides = array<i32>} : memref<8x128xf32, #tpu.memory_space<vmem>>, vector<8x128xf32>,
    return
  }
  func.func @transform_0(%arg0: i32) -> (i32, i32) {
    %c0_i32 = arith.constant 0 : i32
    %c0_i32_0 = arith.constant 0 : i32
    return %arg0, %c0_i32 : i32, i32
  }
  func.func @transform_1(%arg0: i32) -> (i32, i32) {
    %c0_i32 = arith.constant 0 : i32
    %c0_i32_0 = arith.constant 0 : i32
    %c0_i32_1 = arith.constant 0 : i32
    return %c0_i32, %c0_i32_0 : i32, i32
  }
  func.func @transform_2(%arg0: i32) -> (i32, i32) {
    %c0_i32 = arith.constant 0 : i32
    %c0_i32_0 = arith.constant 0 : i32
    return %arg0, %c0_i32 : i32, i32
  }
  func.func @transform_3(%arg0: i32) -> (i32, i32) {
    %c0_i32 = arith.constant 0 : i32
    %c0_i32_0 = arith.constant 0 : i32
    %c0_i32_1 = arith.constant 0 : i32
    return %c0_i32, %c0_i32_0 : i32, i32
  }
  func.func @transform_4(%arg0: i32) -> (i32, i32) {
    %c0_i32 = arith.constant 0 : i32
    %c0_i32_0 = arith.constant 0 : i32
    return %arg0, %c0_i32 : i32, i32
  }
}

module attributes {stable_mosaic.version = 11 : i64} {
  func.func @_normalize_kernel(%arg0: i32, %arg1: memref<3x8x64xf32, #tpu.memory_space<vmem>>, %arg2: memref<8x64xf32, #tpu.memory_space<vmem>>, %arg3: memref<8x64xf32, #tpu.memory_space<vmem>>) attributes {dimension_semantics = [#tpu.dimension_semantics<parallel>], iteration_bounds = array<i64: 1>, scalar_prefetch = 0 : i64, scratch_operands = 0 : i64, tpu.core_type = #tpu.core_type<tc>, window_params = [{transform_indices = @transform_0, window_bounds = array<i64: 3, 8, 64>}, {transform_indices = @transform_1, window_bounds = array<i64: 8, 64>}, {transform_indices = @transform_2, window_bounds = array<i64: 8, 64>}]} {
    %c0 = arith.constant 0 : index
    %c0_0 = arith.constant 0 : index
    %c0_1 = arith.constant 0 : index
    %0 = vector.load %arg1[%c0, %c0_0, %c0_1] : memref<3x8x64xf32, #tpu.memory_space<vmem>>, vector<1x8x64xf32>
    %1 = vector.shape_cast %0 : vector<1x8x64xf32> to vector<8x64xf32>
    %c1 = arith.constant 1 : index
    %c0_2 = arith.constant 0 : index
    %c0_3 = arith.constant 0 : index
    %2 = vector.load %arg1[%c1, %c0_2, %c0_3] : memref<3x8x64xf32, #tpu.memory_space<vmem>>, vector<1x8x64xf32>
    %3 = vector.shape_cast %2 : vector<1x8x64xf32> to vector<8x64xf32>
    %c2 = arith.constant 2 : index
    %c0_4 = arith.constant 0 : index
    %c0_5 = arith.constant 0 : index
    %4 = vector.load %arg1[%c2, %c0_4, %c0_5] : memref<3x8x64xf32, #tpu.memory_space<vmem>>, vector<1x8x64xf32>
    %5 = vector.shape_cast %4 : vector<1x8x64xf32> to vector<8x64xf32>
    %6 = arith.addf %3, %5 : vector<8x64xf32>
    %cst = arith.constant 5.000000e-01 : f32
    %7 = vector.broadcast %cst : f32 to vector<8x64xf32>
    %8 = arith.mulf %6, %7 : vector<8x64xf32>
    %9 = arith.mulf %1, %1 : vector<8x64xf32>
    %cst_6 = arith.constant dense<0.000000e+00> : vector<8xf32>
    %10 = vector.multi_reduction <add>, %9, %cst_6 [1] : vector<8x64xf32> to vector<8xf32>
    %11 = vector.shape_cast %10 : vector<8xf32> to vector<8x1xf32>
    %cst_7 = arith.constant 1.000000e-16 : f32
    %12 = vector.broadcast %cst_7 : f32 to vector<8x1xf32>
    %13 = arith.maximumf %11, %12 : vector<8x1xf32>
    %14 = math.rsqrt %13 : vector<8x1xf32>
    %15 = vector.broadcast %14 : vector<8x1xf32> to vector<8x64xf32>
    %16 = arith.mulf %1, %15 : vector<8x64xf32>
    %17 = arith.mulf %8, %8 : vector<8x64xf32>
    %cst_8 = arith.constant dense<0.000000e+00> : vector<8xf32>
    %18 = vector.multi_reduction <add>, %17, %cst_8 [1] : vector<8x64xf32> to vector<8xf32>
    %19 = vector.shape_cast %18 : vector<8xf32> to vector<8x1xf32>
    %cst_9 = arith.constant 1.000000e-16 : f32
    %20 = vector.broadcast %cst_9 : f32 to vector<8x1xf32>
    %21 = arith.maximumf %19, %20 : vector<8x1xf32>
    %22 = math.rsqrt %21 : vector<8x1xf32>
    %23 = vector.broadcast %22 : vector<8x1xf32> to vector<8x64xf32>
    %24 = arith.mulf %8, %23 : vector<8x64xf32>
    %c0_10 = arith.constant 0 : index
    %c0_11 = arith.constant 0 : index
    %25 = vector.load %arg2[%c0_10, %c0_11] : memref<8x64xf32, #tpu.memory_space<vmem>>, vector<8x64xf32>
    tpu.vector_store %arg2[%c0_10, %c0_11], %16 {strides = array<i32>} : memref<8x64xf32, #tpu.memory_space<vmem>>, vector<8x64xf32>,
    %c0_12 = arith.constant 0 : index
    %c0_13 = arith.constant 0 : index
    %26 = vector.load %arg3[%c0_12, %c0_13] : memref<8x64xf32, #tpu.memory_space<vmem>>, vector<8x64xf32>
    tpu.vector_store %arg3[%c0_12, %c0_13], %24 {strides = array<i32>} : memref<8x64xf32, #tpu.memory_space<vmem>>, vector<8x64xf32>,
    return
  }
  func.func @transform_0(%arg0: i32) -> (i32, i32, i32) {
    %c0_i32 = arith.constant 0 : i32
    %c0_i32_0 = arith.constant 0 : i32
    %c0_i32_1 = arith.constant 0 : i32
    return %c0_i32, %arg0, %c0_i32_0 : i32, i32, i32
  }
  func.func @transform_1(%arg0: i32) -> (i32, i32) {
    %c0_i32 = arith.constant 0 : i32
    %c0_i32_0 = arith.constant 0 : i32
    return %arg0, %c0_i32 : i32, i32
  }
  func.func @transform_2(%arg0: i32) -> (i32, i32) {
    %c0_i32 = arith.constant 0 : i32
    %c0_i32_0 = arith.constant 0 : i32
    return %arg0, %c0_i32 : i32, i32
  }
}

</mosaic_0001>

<bundles_post_ra>
// kernel: angle_proto2.3
= control target key start
LH: loop header
LB: loop body
LE: loop exit
PB: predicated region body
PF: predicated region fallthrough
CT: control target
= control target key end

     0   :  { %vm19_vm0 = vcmask 523264   ;;  %v182_v0 = vmov 0.0   ;;  %vm183_vm1 = vmmov 0   ;;  %v184_v4 = vmov 0   ;;  %s234_s1 = inlined_call_operand.vmem [shape: f32[8,64], index: 1, kind: input, shape index: {}]   ;;  %s235_s0 = inlined_call_operand.vmem [shape: f32[8,64], index: 0, kind: input, shape index: {}]   ;;  %s236_s2 = inlined_call_operand.vmem [shape: s32[8,1], index: 2, kind: input, shape index: {}]   ;;  %s237_s3 = inlined_call_operand.vmem [shape: s32[1,8], index: 3, kind: input, shape index: {}]   ;;  %s238_s4 = inlined_call_operand.vmem [shape: f32[8,128], index: 4, kind: output, shape index: {}]  }
   0x1   :  { %172 = vmatprep.subr.mxu0 %v182_v0  ;;  %v18_v1 = vld [vmem:[%s234_s1] sm:$0xff]  ;;  %174 = vmatprep.mubr.msk.f32.mxu0 %vm183_vm1, %v182_v0  ;;  %vm109_vm2 = vcmask 64512   ;;  %v122_v8 = vlaneseq }
   0x2   :  { %v96_v2 = vld [vmem:[%s236_s2] sm:$0xff]  ;;  %173 = vmatpush3.xpose.msk.msra.mxu0 %vm19_vm0, %v18_v1  ;;  %180 = vset.pattern.permute.xlu1 %v184_v4 }
   0x3   :  { %v17_v3 = vld [vmem:[%s235_s0] sm:$0xff]  ;;  %99 = vperm.xlu1 %180, %v96_v2   ;;  %181 = vset.pattern.permute.xlu0 %v184_v4  ;;  %v123_v11 = vand.u32 127, %v122_v8  ;;  %v142_v33 = vshrl.u32 %v122_v8, 7 }
   0x4   :  { %v167_v9 = vld [vmem:[%s237_s3] ss:$0 sm:$0xff] }
   0x5   :  { %175 = vmatmul.mubr.msk.f32.vlgmr.msra.gmra.mrb[0].mxu0 %vm19_vm0, %v17_v3  ;;  %vm151_vm6 = vcmp.eq.s32.totalorder %v123_v11, 1  ;;  %vm149_vm7 = vcmp.eq.s32.totalorder %v123_v11, 0  ;;  %vm154_vm8 = vcmp.eq.s32.totalorder %v123_v11, 2  ;;  %vm157_vm9 = vcmp.eq.s32.totalorder %v123_v11, 3 }
  0x82   :  { %v100_v10 = vpop.permute.xlu1 %99 }
  0x83   :  { %vm105_vm3 = vcmp.eq.s32.totalorder %v100_v10, %v167_v9 }
  0x84   :  { %v168_v15 = vsel %vm105_vm3, 1.0, %v182_v0 }
  0x85   :  { %v116_v21 = vsel %vm109_vm2, %v168_v15, 0.0 }
  0xd8   :  { %v92_v5 = vpop.f32.mrb[0].mxu0 }
  0xd9   :  { %v176_v6 = vpop.f32.mrb[1].mxu0  ;;  %v119_v7 = vsel %vm109_vm2, %v92_v5, -inf  ;;  %v108_v18 = vmul.f32 %v168_v15, %v92_v5  ;;  %v113_v20 = vsel %vm109_vm2, %v92_v5, 0.0 }
  0xda   :  { %120 = vmax.xlane.f32.xlu0 %v119_v7 }
  0xdb   :  { %v110_v19 = vsel %vm109_vm2, %v108_v18, 0.0 }
 0x167   :  { %v121_v12 = vpop.xlane.xlu0 %120 }
 0x168   :  { %vm124_vm4 = vcmp.eq.f32.partialorder %v92_v5, %v121_v12 }
 0x169   :  { %v125_v13 = vsel %vm124_vm4, %v123_v11, 8 }
 0x16a   :  { %v126_v14 = vsel %vm109_vm2, %v125_v13, 2147483647 }
 0x16b   :  { %v128_v16 = vshra.s32 %v126_v14, 16  ;;  %v127_v22 = vand.u32 65535, %v126_v14 }
 0x16d   :  { %v130_v17 = vcvt.s32.f32 %v128_v16  ;;  %v129_v24 = vcvt.s32.f32 %v127_v22 }
 0x16f   :  { %131 = vmin.xlane.f32.xlu0 %v130_v17 }
 0x173   :  { %111 = vadd.xlane.f32.xlu0 %v110_v19 }
 0x177   :  { %114 = vadd.xlane.f32.xlu0 %v113_v20 }
 0x17b   :  { %117 = vadd.xlane.f32.xlu0 %v116_v21 }
 0x1fc   :  { %v132_v23 = vpop.xlane.xlu0 %131 }
 0x1fd   :  { %vm133_vm5 = vcmp.eq.f32.partialorder %v130_v17, %v132_v23  ;;  %v138_v28 = vcvt.f32.s32 %v132_v23 }
 0x1fe   :  { %v134_v25 = vsel %vm133_vm5, %v129_v24, inf }
 0x1ff   :  { %135 = vmin.xlane.f32.xlu1 %v134_v25  ;;  %v139_v31 = vshll.u32 %v138_v28, 16 }
 0x200   :  { %v112_v26 = vpop.xlane.xlu0 %111 }
 0x201   :  { %v150_v35 = vsel %vm149_vm7, %v112_v26, 0.0 }
 0x204   :  { %v115_v27 = vpop.xlane.xlu0 %114 }
 0x205   :  { %v152_v32 = vsel %vm151_vm6, %v115_v27, 0.0 }
 0x206   :  { %v153_v38 = vadd.f32 %v152_v32, %v150_v35 }
 0x208   :  { %v118_v29 = vpop.xlane.xlu0 %117 }
 0x209   :  { %v155_v36 = vsel %vm154_vm8, %v118_v29, 0.0 }
 0x20a   :  { %v156_v39 = vadd.f32 %v155_v36, %v153_v38 }
 0x28c   :  { %v136_v30 = vpop.xlane.xlu1 %135 }
 0x28d   :  { %v137_v34 = vcvt.f32.s32 %v136_v30 }
 0x28f   :  { %v140_v37 = vadd.s32 %v139_v31, %v137_v34 }
 0x291   :  { %vm146_vm10 = vcmp.eq.s32.totalorder %v140_v37, %v142_v33 }
 0x292   :  { %v169_v40 = vsel %vm146_vm10, 1.0, %v182_v0 }
 0x293   :  { %v158_v41 = vsel %vm157_vm9, %v169_v40, 0.0 }
 0x294   :  { %v159_v42 = vadd.f32 %v158_v41, %v156_v39 }
 0x296   :  { %160 = vst [vmem:[%s238_s4] sm:$0xff] %v159_v42 }

// kernel: angle_proto2.2
= control target key start
LH: loop header
LB: loop body
LE: loop exit
PB: predicated region body
PF: predicated region fallthrough
CT: control target
= control target key end

     0   :  { %8 = vsyncpa [#allocation3], 0  ;;  %s88_s9 = smov [#allocation2]   ;;  %s128_s0 = inlined_call_operand.hbm [shape: f32[3,8,64], index: 0, kind: input, shape index: {}]   ;;  %s129_s1 = inlined_call_operand.vmem [shape: f32[8,64], index: 1, kind: output, shape index: {0}]   ;;  %s130_s2 = inlined_call_operand.vmem [shape: f32[8,64], index: 2, kind: output, shape index: {1}]  }
   0x1   :  { %s14_s10 = sshll.u32 %s88_s9, 4  ;;  %s64_s13 = scalar_lea.hbm %s128_s0, 384  ;;  %s15_s10 = int_to_ptr.vmem [resolvable:$true] %s14_s10 }
   0x2   :  { %p65_p0 = scmp.ne.s32.totalorder %s128_s0, %s64_s13  ;;  %p68_p1 = scmp.lt.u32.totalorder %s64_s13, %s128_s0 }
   0x4   :  { %p70_p2 = pnand %p68_p1, %p65_p0 }
   0x6   :  { %73 = shalt.err (!%p70_p2)
}
   0x7   :  { %s74_s18 = scalar_lea.vmem %s15_s10, 384  ;;  %p79_p4 = scmp.lt.s32.totalorder %s15_s10, %s15_s10 }
   0x8   :  { %p75_p3 = scmp.ne.s32.totalorder %s15_s10, %s74_s18  ;;  %p80_p5 = scmp.lt.s32.totalorder %s74_s18, %s74_s18 }
   0xa   :  { %p81_p6 = por %p80_p5, %p79_p4 }
   0xc   :  { %p82_p7 = pnand %p81_p6, %p75_p3 }
   0xe   :  { %85 = shalt.err (!%p82_p7)
}
   0xf   :  { %s89_s19 = smov 128   ;;  %s90_s20 = smov 8  }
  0x10   :  { %20 = dma.hbm_to_vmem [thread:$0]  %s128_s0, 384, %s15_s10, [#allocation3], %s89_s19, %s89_s19, %s90_s20  }
  0x11   :  { %86 = dma.done.wait [#allocation3], 384  }
  0x12   :  { %87 = vsyncadd [#allocation3], 4294966912  ;;  %v24_v0 = vld [vmem:[#allocation2] sm:$0xff]  ;;  %vm32_vm0 = vcmask 523264   ;;  %v26_v1 = vld [vmem:[#allocation2 + $0x8] sm:$0xff] }
  0x13   :  { %v28_v2 = vld [vmem:[#allocation2 + $0x10] sm:$0xff]  ;;  %v31_v3 = vmul.f32 %v24_v0, %v24_v0 }
  0x14   :  { %v29_v4 = vadd.f32 %v28_v2, %v26_v1 }
  0x15   :  { %v33_v5 = vsel %vm32_vm0, %v31_v3, 0.0 }
  0x16   :  { %v30_v6 = vmul.f32 0.5, %v29_v4  ;;  %34 = vadd.xlane.f32.xlu0 %v33_v5 }
  0x18   :  { %v39_v7 = vmul.f32 %v30_v6, %v30_v6 }
  0x1a   :  { %v40_v8 = vsel %vm32_vm0, %v39_v7, 0.0 }
  0x1b   :  { %41 = vadd.xlane.f32.xlu0 %v40_v8 }
  0xa3   :  { %v35_v9 = vpop.xlane.xlu0 %34 }
  0xa4   :  { %v36_v10 = vmax.f32 %v35_v9, 1e-16 }
  0xa6   :  { %60 = vrsqrt.f32 %v36_v10 }
  0xa8   :  { %v42_v11 = vpop.xlane.xlu0 %41 }
  0xa9   :  { %v43_v12 = vmax.f32 %v42_v11, 1e-16 }
  0xab   :  { %62 = vrsqrt.f32 %v43_v12 }
  0xb0   :  { %v61_v13 = vpop.eup %60 }
  0xb1   :  { %v38_v14 = vmul.f32 %v61_v13, %v24_v0 }
  0xb3   :  { %46 = vst.msk [vmem:[%s129_s1] sm:$0xff] %vm32_vm0, %v38_v14 }
  0xb5   :  { %v63_v15 = vpop.eup %62 }
  0xb6   :  { %v45_v16 = vmul.f32 %v63_v15, %v30_v6 }
  0xb8   :  { %47 = vst.msk [vmem:[%s130_s2] sm:$0xff] %vm32_vm0, %v45_v16 }
  0xb9   :  { %56 = vsyncpa [#allocation3], 1 }

</bundles_post_ra>
